<compile_context>
chip_gen: v7x
topology: tpu7x:2x2x1
jax: 0.10.0
libtpu: 0.0.40
codegen_flags: <defaults>
</compile_context>

<pallas_src>
import functools

import jax
import jax.numpy as jnp
from jax.experimental import pallas as pl
from jax.experimental.pallas import tpu as pltpu

_LANE = 128


# --------------------------------------------------------------------------
# Hardware / tiling helpers
# --------------------------------------------------------------------------
def _round_up(x, m):
    return ((x + m - 1) // m) * m


@functools.lru_cache(maxsize=None)
def _vmem_capacity_bytes():
    """Per-core VMEM capacity; conservative 64 MiB (v7x) fallback."""
    try:
        return int(pltpu.get_tpu_info().vmem_capacity_bytes)
    except Exception:
        return 64 << 20


@functools.lru_cache(maxsize=None)
def _bf16_eup_ok():
    """bf16 VPU/EUP exists on v6e and later; keep f32 tanh on v5e and older."""
    try:
        kind = jax.devices()[0].device_kind.lower()
    except Exception:
        return False
    return not any(t in kind for t in ("v2", "v3", "v4", "v5"))


def _pick_tm(N, V, Dp, *, target_rows=512):
    """Row-tile size: multiple of 8, <= ~512 rows, sized to a generation-aware
    VMEM budget, with >=2 grid steps when N is large (megacore sharding)."""
    budget = int(_vmem_capacity_bytes() * 0.4)       # leave room for weights
    per_row = 2 * (V + 1) * Dp * 4                   # dbl-buffered inputs + out
    cap_rows = max(8, (budget // max(per_row, 1)) // 8 * 8)
    tm = min(_round_up(min(target_rows, N), 8), cap_rows)
    tm = max(8, (tm // 8) * 8)
    # Guarantee >=2 grid steps for large N so the parallel axis can shard
    # across both v7x TensorCores (harmless one extra step elsewhere).
    if N >= 256 and pl.cdiv(N, tm) < 2:
        tm = max(8, _round_up(pl.cdiv(N, 2), 8))
    return tm


def _vmem_limit_bytes(tm, Dp, V):
    cap = _vmem_capacity_bytes()
    pipeline = 2 * (V + 1) * tm * Dp * 4
    weights = 2 * ((Dp * _LANE + _LANE * _LANE) * 2 + 2 * _LANE * 4)
    needed = pipeline + weights + (4 << 20)          # + headroom
    return int(min(max(needed, 16 << 20), cap))


def _pad_views(views, N, D, tm, Dp):
    """Zero-pad rows to a multiple of tm and lanes to Dp (multiple of 128)."""
    Np = _round_up(N, tm)
    if (Np, Dp) != (N, D):
        views = [jnp.pad(v, ((0, Np - N), (0, Dp - D))) for v in views]
    return views, Np


# --------------------------------------------------------------------------
# Kernel 1: attention fusion
#   scores_v = w3 . tanh( W2 tanh( W1 x_v + b1 ) )   per view v
#   weight   = softmax over views
#   out      = sum_v weight_v * x_v
# --------------------------------------------------------------------------
def _make_attention_kernel(V, hp, bf16_act):
    def kernel(*refs):
        x_refs = refs[:V]
        w1 = refs[V][...]        # (Dp, hp)  bf16, zero-padded to lane width
        b1 = refs[V + 1][...]    # (1, hp)   f32
        w2 = refs[V + 2][...]    # (hp, hp)  bf16
        w3 = refs[V + 3][...]    # (1, hp)   f32, w3 stored as a row
        o_ref = refs[V + 4]
        tm = o_ref.shape[0]

        # Hoisted: built once, reused for every view (JAX does not CSE
        # broadcast_in_dim, so doing `+ b1` inside the loop rebuilds it V x).
        b1b = jnp.broadcast_to(b1, (tm, hp))

        scores = []
        for v in range(V):                 # V is small & static -> unrolled
            # bf16 MXU matmuls with f32 accumulation (scores only feed
            # tanh + softmax, so bf16 precision is plenty).
            xv = x_refs[v][...].astype(jnp.bfloat16)            # (tm, Dp)
            h1 = jnp.dot(xv, w1, preferred_element_type=jnp.float32) + b1b
            if bf16_act:
                h1 = jnp.tanh(h1.astype(jnp.bfloat16))          # bf16 EUP
            else:
                h1 = jnp.tanh(h1).astype(jnp.bfloat16)          # f32 EUP (v5e)
            h2 = jnp.dot(h1, w2, preferred_element_type=jnp.float32)
            if bf16_act:
                h2 = jnp.tanh(h2.astype(jnp.bfloat16)).astype(jnp.float32)
            else:
                h2 = jnp.tanh(h2)
            # Lane-dense score: multiply by the w3 row + lane-axis reduce
            # instead of a lane-width-1 MXU matmul.
            scores.append(jnp.sum(h2 * w3, axis=1, keepdims=True))  # (tm,1) f32

        # Softmax over views, fully elementwise on the V (tm, 1) columns.
        m = scores[0]
        for v in range(1, V):
            m = jnp.maximum(m, scores[v])
        exps = [jnp.exp(s - m) for s in scores]
        denom = exps[0]
        for v in range(1, V):
            denom = denom + exps[v]
        inv = pl.reciprocal(denom, approx=True)      # EUP vrcp slot, ~free

        # Re-read the view tiles from VMEM instead of keeping f32 copies live
        # across the score loop (VMEM reloads are nearly free; less pressure).
        acc = (exps[0] * inv) * x_refs[0][...].astype(jnp.float32)
        for v in range(1, V):
            acc = acc + (exps[v] * inv) * x_refs[v][...].astype(jnp.float32)
        o_ref[...] = acc.astype(o_ref.dtype)

    return kernel


def _pad_attention_weights(w1, b1, w2, w3):
    """Zero-pad the tiny encoder weights to 128 lanes; matmul weights in bf16."""
    D, H1 = w1.shape
    H2 = w2.shape[1]
    hp = _LANE
    assert H1 <= hp and H2 <= hp
    Dp = _round_up(D, hp)
    w1p = (jnp.zeros((Dp, hp), jnp.float32)
           .at[:D, :H1].set(w1.astype(jnp.float32)).astype(jnp.bfloat16))
    b1p = jnp.zeros((1, hp), jnp.float32).at[:, :H1].set(
        b1.reshape(1, H1).astype(jnp.float32))
    w2p = (jnp.zeros((hp, hp), jnp.float32)
           .at[:H1, :H2].set(w2.astype(jnp.float32)).astype(jnp.bfloat16))
    w3p = jnp.zeros((1, hp), jnp.float32).at[:, :H2].set(
        w3.reshape(1, H2).astype(jnp.float32))
    return w1p, b1p, w2p, w3p


def attention_fusion(views, padded_weights, *, tm=None):
    views = list(views)
    V = len(views)
    w1p, b1p, w2p, w3p = padded_weights
    N, D = views[0].shape
    hp = _LANE
    Dp = w1p.shape[0]
    assert Dp == _round_up(D, hp)

    if tm is None:
        tm = _pick_tm(N, V, Dp)
    else:
        tm = max(8, _round_up(int(tm), 8))

    out_dtype = views[0].dtype
    views, Np = _pad_views(views, N, D, tm, Dp)

    in_specs = [pl.BlockSpec((tm, Dp), lambda i: (i, 0)) for _ in range(V)]
    in_specs += [
        pl.BlockSpec((Dp, hp), lambda i: (0, 0)),
        pl.BlockSpec((1, hp), lambda i: (0, 0)),
        pl.BlockSpec((hp, hp), lambda i: (0, 0)),
        pl.BlockSpec((1, hp), lambda i: (0, 0)),
    ]

    out = pl.pallas_call(
        _make_attention_kernel(V, hp, _bf16_eup_ok()),
        out_shape=jax.ShapeDtypeStruct((Np, Dp), out_dtype),
        grid_spec=pltpu.PrefetchScalarGridSpec(
            num_scalar_prefetch=0,
            grid=(Np // tm,),
            in_specs=in_specs,
            out_specs=pl.BlockSpec((tm, Dp), lambda i: (i, 0)),
        ),
        compiler_params=pltpu.CompilerParams(
            dimension_semantics=("parallel",),
            vmem_limit_bytes=_vmem_limit_bytes(tm, Dp, V),
        ),
    )(*views, w1p, b1p, w2p, w3p)

    if (Np, Dp) != (N, D):
        out = out[:N, :D]
    return out


# --------------------------------------------------------------------------
# Kernel 2: weighted sum over views ('average' and 'weight' fusion)
#   out = sum_v w[v] * x_v
# --------------------------------------------------------------------------
def _make_weighted_sum_kernel(V):
    def kernel(*refs):
        w_ref = refs[0]                     # (V,) scalars in SMEM
        x_refs = refs[1:1 + V]
        o_ref = refs[1 + V]
        acc = w_ref[0] * x_refs[0][...].astype(jnp.float32)
        for v in range(1, V):
            acc = acc + w_ref[v] * x_refs[v][...].astype(jnp.float32)
        o_ref[...] = acc.astype(o_ref.dtype)

    return kernel


def weighted_sum_fusion(views, weights, *, tm=None):
    views = list(views)
    V = len(views)
    N, D = views[0].shape
    Dp = _round_up(D, _LANE)

    if tm is None:
        tm = _pick_tm(N, V, Dp)
    else:
        tm = max(8, _round_up(int(tm), 8))

    out_dtype = views[0].dtype
    views, Np = _pad_views(views, N, D, tm, Dp)

    in_specs = [pl.BlockSpec(memory_space=pltpu.MemorySpace.SMEM)]
    in_specs += [pl.BlockSpec((tm, Dp), lambda i: (i, 0)) for _ in range(V)]

    out = pl.pallas_call(
        _make_weighted_sum_kernel(V),
        out_shape=jax.ShapeDtypeStruct((Np, Dp), out_dtype),
        grid_spec=pltpu.PrefetchScalarGridSpec(
            num_scalar_prefetch=0,
            grid=(Np // tm,),
            in_specs=in_specs,
            out_specs=pl.BlockSpec((tm, Dp), lambda i: (i, 0)),
        ),
        compiler_params=pltpu.CompilerParams(
            dimension_semantics=("parallel",),
            vmem_limit_bytes=_vmem_limit_bytes(tm, Dp, V),
        ),
    )(weights.astype(jnp.float32), *views)

    if (Np, Dp) != (N, D):
        out = out[:N, :D]
    return out


# --------------------------------------------------------------------------
# FusionLayer: JAX wrapper mirroring the PyTorch module.
# --------------------------------------------------------------------------
class FusionLayer:
    def __init__(self, num_views, fusion_type, in_size, hidden_size=32, *,
                 key=None):
        self.fusion_type = fusion_type
        self.num_views = num_views
        self.in_size = in_size
        if fusion_type == "weight":
            # nn.Parameter(torch.ones(num_views) / num_views)
            self.weight = jnp.ones((num_views,), jnp.float32) / num_views
        if fusion_type == "attention":
            if key is None:
                key = jax.random.PRNGKey(0)
            k1, k2, k3, k4 = jax.random.split(key, 4)
            # TODO(synk): synthetic uniform init; load real torch nn.Linear
            # (kaiming-uniform) weights for checkpoint parity.  Matches spec:
            # only the first Linear has a bias, the 2nd/3rd are bias=False.
            s1 = 1.0 / jnp.sqrt(in_size)
            s2 = 1.0 / jnp.sqrt(hidden_size)
            s3 = 1.0 / jnp.sqrt(32.0)
            self.w1 = jax.random.uniform(k1, (in_size, hidden_size),
                                         jnp.float32, -s1, s1)
            self.b1 = jax.random.uniform(k2, (hidden_size,),
                                         jnp.float32, -s1, s1)
            self.w2 = jax.random.uniform(k3, (hidden_size, 32),
                                         jnp.float32, -s2, s2)
            self.w3 = jax.random.uniform(k4, (32, 1), jnp.float32, -s3, s3)
            # Padded (+bf16) weights built once, reused every forward call.
            self._padded = _pad_attention_weights(self.w1, self.b1,
                                                  self.w2, self.w3)

    def __call__(self, emb_list, *, tm=None):
        # emb_list: dict of view_name -> [N, D]; insertion order matches torch.
        # Views are passed to the kernel un-stacked (no extra HBM pass).
        views = [v for _, v in emb_list.items()]
        V = len(views)
        if self.fusion_type == "average":
            w = jnp.ones((V,), jnp.float32) / V
            return weighted_sum_fusion(views, w, tm=tm)
        elif self.fusion_type == "weight":
            w = jax.nn.softmax(self.weight, axis=0)
            return weighted_sum_fusion(views, w, tm=tm)
        elif self.fusion_type == "attention":
            return attention_fusion(views, self._padded, tm=tm)
        else:
            raise ValueError("Please using a correct fusion type")


# --------------------------------------------------------------------------
# Pure-JAX references for sanity checking.
# --------------------------------------------------------------------------
def _ref_attention(views, w1, b1, w2, w3):
    x = jnp.stack(views, axis=1)            # (N, V, D)
    h = jnp.tanh(x @ w1 + b1)
    h = jnp.tanh(h @ w2)
    s = h @ w3                              # (N, V, 1)
    w = jax.nn.softmax(s, axis=1)
    return jnp.sum(w * x, axis=1)


def _ref_weighted(views, w):
    x = jnp.stack(views, axis=1)
    return jnp.sum(w[None, :, None] * x, axis=1)


if __name__ == "__main__":
    key = jax.random.PRNGKey(0)
    N, V, D = 32, 3, 128  # batch, num_views, in_size
    kx, kp = jax.random.split(key)
    view_keys = jax.random.split(kx, V)
    emb = {
        f"view{i}": jax.random.normal(view_keys[i], (N, D), jnp.float32)
        for i in range(V)
    }
    views = [emb[f"view{i}"] for i in range(V)]

    # --- attention fusion (main hot path), default tiling ---
    layer_att = FusionLayer(V, "attention", D, hidden_size=32, key=kp)
    out_att = layer_att(emb)
    jax.block_until_ready(out_att)
    ref_att = _ref_attention(views, layer_att.w1, layer_att.b1,
                             layer_att.w2, layer_att.w3)
    assert out_att.shape == (N, D)
    # bf16 score-path matmuls/tanh + approx reciprocal -> looser tolerance
    # vs. the all-f32 reference.
    assert jnp.allclose(out_att, ref_att, atol=3e-2, rtol=3e-2)

    # --- attention fusion with a multi-step grid (tm=8 -> 4 grid steps) ---
    out_att_t = layer_att(emb, tm=8)
    jax.block_until_ready(out_att_t)
    assert jnp.allclose(out_att_t, ref_att, atol=3e-2, rtol=3e-2)

    # --- attention fusion on non-aligned N / D (exercises padding path) ---
    Nr, Dr = 20, 96
    emb_r = {
        f"v{i}": jax.random.normal(jax.random.PRNGKey(100 + i), (Nr, Dr),
                                   jnp.float32)
        for i in range(V)
    }
    views_r = [emb_r[f"v{i}"] for i in range(V)]
    layer_att_r = FusionLayer(V, "attention", Dr, hidden_size=32, key=kp)
    out_r = layer_att_r(emb_r)
    jax.block_until_ready(out_r)
    ref_r = _ref_attention(views_r, layer_att_r.w1, layer_att_r.b1,
                           layer_att_r.w2, layer_att_r.w3)
    assert out_r.shape == (Nr, Dr)
    assert jnp.allclose(out_r, ref_r, atol=3e-2, rtol=3e-2)

    # --- weight fusion ---
    layer_w = FusionLayer(V, "weight", D)
    out_w = layer_w(emb)
    jax.block_until_ready(out_w)
    ref_w = _ref_weighted(views, jax.nn.softmax(layer_w.weight, axis=0))
    assert jnp.allclose(out_w, ref_w, atol=1e-5, rtol=1e-5)

    # --- average fusion (multi-step grid) ---
    layer_a = FusionLayer(V, "average", D)
    out_a = layer_a(emb, tm=8)
    jax.block_until_ready(out_a)
    ref_a = _ref_weighted(views, jnp.ones((V,), jnp.float32) / V)
    assert jnp.allclose(out_a, ref_a, atol=1e-5, rtol=1e-5)

    print("KERNEL_OK")
</pallas_src>

<mosaic_0001>
module attributes {stable_mosaic.version = 11 : i64} {
  func.func @kernel(%arg0: i32, %arg1: memref<32x128xf32, #tpu.memory_space<vmem>>, %arg2: memref<32x128xf32, #tpu.memory_space<vmem>>, %arg3: memref<32x128xf32, #tpu.memory_space<vmem>>, %arg4: memref<128x128xbf16, #tpu.memory_space<vmem>>, %arg5: memref<1x128xf32, #tpu.memory_space<vmem>>, %arg6: memref<128x128xbf16, #tpu.memory_space<vmem>>, %arg7: memref<1x128xf32, #tpu.memory_space<vmem>>, %arg8: memref<32x128xf32, #tpu.memory_space<vmem>>) attributes {dimension_semantics = [#tpu.dimension_semantics<parallel>], iteration_bounds = array<i64: 1>, scalar_prefetch = 0 : i64, scratch_operands = 0 : i64, tpu.core_type = #tpu.core_type<tc>, window_params = [{transform_indices = @transform_0, window_bounds = array<i64: 32, 128>}, {transform_indices = @transform_1, window_bounds = array<i64: 32, 128>}, {transform_indices = @transform_2, window_bounds = array<i64: 32, 128>}, {pipeline_mode = #tpu.pipeline_mode<synchronous>, transform_indices = @transform_3, window_bounds = array<i64: 128, 128>}, {pipeline_mode = #tpu.pipeline_mode<synchronous>, transform_indices = @transform_4, window_bounds = array<i64: 1, 128>}, {pipeline_mode = #tpu.pipeline_mode<synchronous>, transform_indices = @transform_5, window_bounds = array<i64: 128, 128>}, {pipeline_mode = #tpu.pipeline_mode<synchronous>, transform_indices = @transform_6, window_bounds = array<i64: 1, 128>}, {transform_indices = @transform_7, window_bounds = array<i64: 32, 128>}]} {
    %c0 = arith.constant 0 : index
    %c0_0 = arith.constant 0 : index
    %0 = vector.load %arg4[%c0, %c0_0] : memref<128x128xbf16, #tpu.memory_space<vmem>>, vector<128x128xbf16>
    %c0_1 = arith.constant 0 : index
    %c0_2 = arith.constant 0 : index
    %1 = vector.load %arg5[%c0_1, %c0_2] : memref<1x128xf32, #tpu.memory_space<vmem>>, vector<1x128xf32>
    %c0_3 = arith.constant 0 : index
    %c0_4 = arith.constant 0 : index
    %2 = vector.load %arg6[%c0_3, %c0_4] : memref<128x128xbf16, #tpu.memory_space<vmem>>, vector<128x128xbf16>
    %c0_5 = arith.constant 0 : index
    %c0_6 = arith.constant 0 : index
    %3 = vector.load %arg7[%c0_5, %c0_6] : memref<1x128xf32, #tpu.memory_space<vmem>>, vector<1x128xf32>
    %4 = vector.shape_cast %1 : vector<1x128xf32> to vector<1x128xf32>
    %5 = vector.broadcast %4 : vector<1x128xf32> to vector<32x128xf32>
    %c0_7 = arith.constant 0 : index
    %c0_8 = arith.constant 0 : index
    %6 = vector.load %arg1[%c0_7, %c0_8] : memref<32x128xf32, #tpu.memory_space<vmem>>, vector<32x128xf32>
    %7 = arith.truncf %6 : vector<32x128xf32> to vector<32x128xbf16>
    %cst = arith.constant dense<0.000000e+00> : vector<32x128xf32>
    %8 = tpu.matmul %7, %0, %cst {dimension_numbers = #tpu.dot_dimension_numbers<[1], [0], [0], [1], [0, 0, 1, 1], [], []>} : vector<32x128xbf16>, vector<128x128xbf16>, vector<32x128xf32> -> vector<32x128xf32>
    %9 = arith.addf %8, %5 : vector<32x128xf32>
    %10 = arith.truncf %9 : vector<32x128xf32> to vector<32x128xbf16>
    %11 = math.tanh %10 : vector<32x128xbf16>
    %cst_9 = arith.constant dense<0.000000e+00> : vector<32x128xf32>
    %12 = tpu.matmul %11, %2, %cst_9 {dimension_numbers = #tpu.dot_dimension_numbers<[1], [0], [0], [1], [0, 0, 1, 1], [], []>} : vector<32x128xbf16>, vector<128x128xbf16>, vector<32x128xf32> -> vector<32x128xf32>
    %13 = arith.truncf %12 : vector<32x128xf32> to vector<32x128xbf16>
    %14 = math.tanh %13 : vector<32x128xbf16>
    %15 = arith.extf %14 : vector<32x128xbf16> to vector<32x128xf32>
    %16 = vector.broadcast %3 : vector<1x128xf32> to vector<32x128xf32>
    %17 = arith.mulf %15, %16 : vector<32x128xf32>
    %cst_10 = arith.constant dense<0.000000e+00> : vector<32xf32>
    %18 = vector.multi_reduction <add>, %17, %cst_10 [1] : vector<32x128xf32> to vector<32xf32>
    %19 = vector.shape_cast %18 : vector<32xf32> to vector<32x1xf32>
    %c0_11 = arith.constant 0 : index
    %c0_12 = arith.constant 0 : index
    %20 = vector.load %arg2[%c0_11, %c0_12] : memref<32x128xf32, #tpu.memory_space<vmem>>, vector<32x128xf32>
    %21 = arith.truncf %20 : vector<32x128xf32> to vector<32x128xbf16>
    %cst_13 = arith.constant dense<0.000000e+00> : vector<32x128xf32>
    %22 = tpu.matmul %21, %0, %cst_13 {dimension_numbers = #tpu.dot_dimension_numbers<[1], [0], [0], [1], [0, 0, 1, 1], [], []>} : vector<32x128xbf16>, vector<128x128xbf16>, vector<32x128xf32> -> vector<32x128xf32>
    %23 = arith.addf %22, %5 : vector<32x128xf32>
    %24 = arith.truncf %23 : vector<32x128xf32> to vector<32x128xbf16>
    %25 = math.tanh %24 : vector<32x128xbf16>
    %cst_14 = arith.constant dense<0.000000e+00> : vector<32x128xf32>
    %26 = tpu.matmul %25, %2, %cst_14 {dimension_numbers = #tpu.dot_dimension_numbers<[1], [0], [0], [1], [0, 0, 1, 1], [], []>} : vector<32x128xbf16>, vector<128x128xbf16>, vector<32x128xf32> -> vector<32x128xf32>
    %27 = arith.truncf %26 : vector<32x128xf32> to vector<32x128xbf16>
    %28 = math.tanh %27 : vector<32x128xbf16>
    %29 = arith.extf %28 : vector<32x128xbf16> to vector<32x128xf32>
    %30 = vector.broadcast %3 : vector<1x128xf32> to vector<32x128xf32>
    %31 = arith.mulf %29, %30 : vector<32x128xf32>
    %cst_15 = arith.constant dense<0.000000e+00> : vector<32xf32>
    %32 = vector.multi_reduction <add>, %31, %cst_15 [1] : vector<32x128xf32> to vector<32xf32>
    %33 = vector.shape_cast %32 : vector<32xf32> to vector<32x1xf32>
    %c0_16 = arith.constant 0 : index
    %c0_17 = arith.constant 0 : index
    %34 = vector.load %arg3[%c0_16, %c0_17] : memref<32x128xf32, #tpu.memory_space<vmem>>, vector<32x128xf32>
    %35 = arith.truncf %34 : vector<32x128xf32> to vector<32x128xbf16>
    %cst_18 = arith.constant dense<0.000000e+00> : vector<32x128xf32>
    %36 = tpu.matmul %35, %0, %cst_18 {dimension_numbers = #tpu.dot_dimension_numbers<[1], [0], [0], [1], [0, 0, 1, 1], [], []>} : vector<32x128xbf16>, vector<128x128xbf16>, vector<32x128xf32> -> vector<32x128xf32>
    %37 = arith.addf %36, %5 : vector<32x128xf32>
    %38 = arith.truncf %37 : vector<32x128xf32> to vector<32x128xbf16>
    %39 = math.tanh %38 : vector<32x128xbf16>
    %cst_19 = arith.constant dense<0.000000e+00> : vector<32x128xf32>
    %40 = tpu.matmul %39, %2, %cst_19 {dimension_numbers = #tpu.dot_dimension_numbers<[1], [0], [0], [1], [0, 0, 1, 1], [], []>} : vector<32x128xbf16>, vector<128x128xbf16>, vector<32x128xf32> -> vector<32x128xf32>
    %41 = arith.truncf %40 : vector<32x128xf32> to vector<32x128xbf16>
    %42 = math.tanh %41 : vector<32x128xbf16>
    %43 = arith.extf %42 : vector<32x128xbf16> to vector<32x128xf32>
    %44 = vector.broadcast %3 : vector<1x128xf32> to vector<32x128xf32>
    %45 = arith.mulf %43, %44 : vector<32x128xf32>
    %cst_20 = arith.constant dense<0.000000e+00> : vector<32xf32>
    %46 = vector.multi_reduction <add>, %45, %cst_20 [1] : vector<32x128xf32> to vector<32xf32>
    %47 = vector.shape_cast %46 : vector<32xf32> to vector<32x1xf32>
    %48 = arith.maximumf %19, %33 : vector<32x1xf32>
    %49 = arith.maximumf %48, %47 : vector<32x1xf32>
    %50 = arith.subf %19, %49 : vector<32x1xf32>
    %51 = math.exp %50 : vector<32x1xf32>
    %52 = arith.subf %33, %49 : vector<32x1xf32>
    %53 = math.exp %52 : vector<32x1xf32>
    %54 = arith.subf %47, %49 : vector<32x1xf32>
    %55 = math.exp %54 : vector<32x1xf32>
    %56 = arith.addf %51, %53 : vector<32x1xf32>
    %57 = arith.addf %56, %55 : vector<32x1xf32>
    %58 = tpu.reciprocal %57 {approx = true} : vector<32x1xf32> -> vector<32x1xf32>
    %59 = arith.mulf %51, %58 : vector<32x1xf32>
    %c0_21 = arith.constant 0 : index
    %c0_22 = arith.constant 0 : index
    %60 = vector.load %arg1[%c0_21, %c0_22] : memref<32x128xf32, #tpu.memory_space<vmem>>, vector<32x128xf32>
    %61 = vector.broadcast %59 : vector<32x1xf32> to vector<32x128xf32>
    %62 = arith.mulf %61, %60 : vector<32x128xf32>
    %63 = arith.mulf %53, %58 : vector<32x1xf32>
    %c0_23 = arith.constant 0 : index
    %c0_24 = arith.constant 0 : index
    %64 = vector.load %arg2[%c0_23, %c0_24] : memref<32x128xf32, #tpu.memory_space<vmem>>, vector<32x128xf32>
    %65 = vector.broadcast %63 : vector<32x1xf32> to vector<32x128xf32>
    %66 = arith.mulf %65, %64 : vector<32x128xf32>
    %67 = arith.addf %62, %66 : vector<32x128xf32>
    %68 = arith.mulf %55, %58 : vector<32x1xf32>
    %c0_25 = arith.constant 0 : index
    %c0_26 = arith.constant 0 : index
    %69 = vector.load %arg3[%c0_25, %c0_26] : memref<32x128xf32, #tpu.memory_space<vmem>>, vector<32x128xf32>
    %70 = vector.broadcast %68 : vector<32x1xf32> to vector<32x128xf32>
    %71 = arith.mulf %70, %69 : vector<32x128xf32>
    %72 = arith.addf %67, %71 : vector<32x128xf32>
    %c0_27 = arith.constant 0 : index
    %c0_28 = arith.constant 0 : index
    %73 = vector.load %arg8[%c0_27, %c0_28] : memref<32x128xf32, #tpu.memory_space<vmem>>, vector<32x128xf32>
    tpu.vector_store %arg8[%c0_27, %c0_28], %72 {strides = array<i32>} : memref<32x128xf32, #tpu.memory_space<vmem>>, vector<32x128xf32>,
    return
  }
  func.func @transform_0(%arg0: i32) -> (i32, i32) {
    %c0_i32 = arith.constant 0 : i32
    %c0_i32_0 = arith.constant 0 : i32
    return %arg0, %c0_i32 : i32, i32
  }
  func.func @transform_1(%arg0: i32) -> (i32, i32) {
    %c0_i32 = arith.constant 0 : i32
    %c0_i32_0 = arith.constant 0 : i32
    return %arg0, %c0_i32 : i32, i32
  }
  func.func @transform_2(%arg0: i32) -> (i32, i32) {
    %c0_i32 = arith.constant 0 : i32
    %c0_i32_0 = arith.constant 0 : i32
    return %arg0, %c0_i32 : i32, i32
  }
  func.func @transform_3(%arg0: i32) -> (i32, i32) {
    %c0_i32 = arith.constant 0 : i32
    %c0_i32_0 = arith.constant 0 : i32
    %c0_i32_1 = arith.constant 0 : i32
    return %c0_i32, %c0_i32_0 : i32, i32
  }
  func.func @transform_4(%arg0: i32) -> (i32, i32) {
    %c0_i32 = arith.constant 0 : i32
    %c0_i32_0 = arith.constant 0 : i32
    %c0_i32_1 = arith.constant 0 : i32
    return %c0_i32, %c0_i32_0 : i32, i32
  }
  func.func @transform_5(%arg0: i32) -> (i32, i32) {
    %c0_i32 = arith.constant 0 : i32
    %c0_i32_0 = arith.constant 0 : i32
    %c0_i32_1 = arith.constant 0 : i32
    return %c0_i32, %c0_i32_0 : i32, i32
  }
  func.func @transform_6(%arg0: i32) -> (i32, i32) {
    %c0_i32 = arith.constant 0 : i32
    %c0_i32_0 = arith.constant 0 : i32
    %c0_i32_1 = arith.constant 0 : i32
    return %c0_i32, %c0_i32_0 : i32, i32
  }
  func.func @transform_7(%arg0: i32) -> (i32, i32) {
    %c0_i32 = arith.constant 0 : i32
    %c0_i32_0 = arith.constant 0 : i32
    return %arg0, %c0_i32 : i32, i32
  }
}

</mosaic_0001>

<bundles_post_ra>
// kernel: tpu_custom_call.1
= control target key start
LH: loop header
LB: loop body
LE: loop exit
PB: predicated region body
PF: predicated region fallthrough
CT: control target
= control target key end

     0   :  { %12 = vsyncpa [#allocation3], 0  ;;  %s1479_s0 = inlined_call_operand.hbm [shape: f32[32,128], index: 0, kind: input, shape index: {}]   ;;  %s1480_s1 = inlined_call_operand.hbm [shape: f32[32,128], index: 1, kind: input, shape index: {}]   ;;  %s1481_s2 = inlined_call_operand.hbm [shape: f32[32,128], index: 2, kind: input, shape index: {}]   ;;  %s1482_s3 = inlined_call_operand.hbm [shape: bf16[128,128], index: 3, kind: input, shape index: {}]   ;;  %s1483_s4 = inlined_call_operand.vmem [shape: f32[1,128], index: 4, kind: input, shape index: {}]   ;;  %s1484_s5 = inlined_call_operand.hbm [shape: bf16[128,128], index: 5, kind: input, shape index: {}]   ;;  %s1485_s6 = inlined_call_operand.vmem [shape: f32[1,128], index: 6, kind: input, shape index: {}]   ;;  %s1486_s7 = inlined_call_operand.hbm [shape: f32[32,128], index: 7, kind: output, shape index: {}]  }
   0x1   :  { %13 = vsyncpa [#allocation6], 0 }
   0x2   :  { %14 = vsyncpa [#allocation9], 0 }
   0x3   :  { %15 = vsyncpa [#allocation4], 0  ;;  %s1153_s24 = smov [#allocation5]   ;;  %s1154_s26 = smov [#allocation8]  }
   0x4   :  { %s33_s25 = sshll.u32 %s1153_s24, 4  ;;  %s57_s27 = sshll.u32 %s1154_s26, 4  ;;  %s34_s25 = int_to_ptr.vmem [resolvable:$true] %s33_s25  ;;  %s1203_s27 = int_to_ptr.vmem [resolvable:$true] %s57_s27 }
   0x5   :  { %s1013_s30 = scalar_lea.hbm %s1480_s1, 512 }
   0x6   :  { %p1014_p0 = scmp.ne.s32.totalorder %s1480_s1, %s1013_s30  ;;  %p1017_p1 = scmp.lt.u32.totalorder %s1013_s30, %s1480_s1 }
   0x8   :  { %p1019_p2 = pnand %p1017_p1, %p1014_p0 }
   0xa   :  { %1022 = shalt.err (!%p1019_p2)
}
   0xb   :  { %s1023_s12 = scalar_lea.vmem %s34_s25, 512  ;;  %p1028_p4 = scmp.lt.s32.totalorder %s34_s25, %s34_s25 }
   0xc   :  { %p1024_p3 = scmp.ne.s32.totalorder %s34_s25, %s1023_s12  ;;  %p1029_p5 = scmp.lt.s32.totalorder %s1023_s12, %s1023_s12 }
   0xe   :  { %p1030_p6 = por %p1029_p5, %p1028_p4 }
  0x10   :  { %p1031_p7 = pnand %p1030_p6, %p1024_p3 }
  0x12   :  { %1034 = shalt.err (!%p1031_p7)
}
  0x13   :  { %s1155_s13 = smov 128   ;;  %s1156_s14 = smov 8  }
  0x14   :  { %39 = dma.hbm_to_vmem [thread:$0]  %s1480_s1, 512, %s34_s25, [#allocation6], %s1155_s13, %s1155_s13, %s1156_s14  }
  0x15   :  { %s1035_s19 = scalar_lea.hbm %s1482_s3, 1024 }
  0x16   :  { %p1036_p8 = scmp.ne.s32.totalorder %s1482_s3, %s1035_s19  ;;  %p1039_p9 = scmp.lt.u32.totalorder %s1035_s19, %s1482_s3 }
  0x18   :  { %p1041_p10 = pnand %p1039_p9, %p1036_p8 }
  0x1a   :  { %1044 = shalt.err (!%p1041_p10)
}
  0x1b   :  { %s1045_s24 = scalar_lea.vmem %s1203_s27, 1024  ;;  %p1050_p12 = scmp.lt.s32.totalorder %s1203_s27, %s1203_s27 }
  0x1c   :  { %p1046_p11 = scmp.ne.s32.totalorder %s1203_s27, %s1045_s24  ;;  %p1051_p13 = scmp.lt.s32.totalorder %s1045_s24, %s1045_s24 }
  0x1e   :  { %p1052_p0 = por %p1051_p13, %p1050_p12 }
  0x20   :  { %p1053_p1 = pnand %p1052_p0, %p1046_p11 }
  0x22   :  { %1056 = shalt.err (!%p1053_p1)
}
  0x23   :  { %s1157_s1 = smov 64   ;;  %s1158_s25 = smov 4  }
  0x24   :  { %63 = dma.hbm_to_vmem [thread:$0]  %s1482_s3, 1024, %s1203_s27, [#allocation9], %s1157_s1, %s1157_s1, %s1158_s25  }
  0x25   :  { %s1159_s29 = smov [#allocation2]   ;;  %s1160_s8 = smov [#allocation7]  }
  0x26   :  { %s21_s30 = sshll.u32 %s1159_s29, 4  ;;  %s45_s9 = sshll.u32 %s1160_s8, 4  ;;  %s22_s30 = int_to_ptr.vmem [resolvable:$true] %s21_s30  ;;  %s1240_s9 = int_to_ptr.vmem [resolvable:$true] %s45_s9 }
  0x27   :  { %s1057_s12 = scalar_lea.hbm %s1479_s0, 512 }
  0x28   :  { %p1058_p2 = scmp.ne.s32.totalorder %s1479_s0, %s1057_s12  ;;  %p1061_p3 = scmp.lt.u32.totalorder %s1057_s12, %s1479_s0 }
  0x2a   :  { %p1063_p4 = pnand %p1061_p3, %p1058_p2 }
  0x2c   :  { %1066 = shalt.err (!%p1063_p4)
}
  0x2d   :  { %s1067_s3 = scalar_lea.vmem %s22_s30, 512  ;;  %p1072_p6 = scmp.lt.s32.totalorder %s22_s30, %s22_s30 }
  0x2e   :  { %p1068_p5 = scmp.ne.s32.totalorder %s22_s30, %s1067_s3  ;;  %p1073_p7 = scmp.lt.s32.totalorder %s1067_s3, %s1067_s3 }
  0x30   :  { %p1074_p8 = por %p1073_p7, %p1072_p6 }
  0x32   :  { %p1075_p9 = pnand %p1074_p8, %p1068_p5 }
  0x34   :  { %1078 = shalt.err (!%p1075_p9)
}
  0x35   :  { %27 = dma.hbm_to_vmem [thread:$0]  %s1479_s0, 512, %s22_s30, [#allocation3], %s1155_s13, %s1155_s13, %s1156_s14  }
  0x36   :  { %s1079_s22 = scalar_lea.hbm %s1481_s2, 512 }
  0x37   :  { %p1080_p10 = scmp.ne.s32.totalorder %s1481_s2, %s1079_s22  ;;  %p1083_p11 = scmp.lt.u32.totalorder %s1079_s22, %s1481_s2 }
  0x39   :  { %p1085_p12 = pnand %p1083_p11, %p1080_p10 }
  0x3b   :  { %1088 = shalt.err (!%p1085_p12)
}
  0x3c   :  { %s1089_s29 = scalar_lea.vmem %s1240_s9, 512  ;;  %p1094_p0 = scmp.lt.s32.totalorder %s1240_s9, %s1240_s9 }
  0x3d   :  { %p1090_p13 = scmp.ne.s32.totalorder %s1240_s9, %s1089_s29  ;;  %p1095_p1 = scmp.lt.s32.totalorder %s1089_s29, %s1089_s29 }
  0x3f   :  { %p1096_p2 = por %p1095_p1, %p1094_p0 }
  0x41   :  { %p1097_p3 = pnand %p1096_p2, %p1090_p13 }
  0x43   :  { %1100 = shalt.err (!%p1097_p3)
}
  0x44   :  { %51 = dma.hbm_to_vmem [thread:$0]  %s1481_s2, 512, %s1240_s9, [#allocation6], %s1155_s13, %s1155_s13, %s1156_s14  }
  0x45   :  { %s1161_s8 = smov [#allocation10]   ;;  %s1101_s15 = scalar_lea.hbm %s1484_s5, 1024 }
  0x46   :  { %s71_s10 = sshll.u32 %s1161_s8, 4  ;;  %p1102_p4 = scmp.ne.s32.totalorder %s1484_s5, %s1101_s15  ;;  %s72_s10 = int_to_ptr.vmem [resolvable:$true] %s71_s10 }
  0x47   :  { %p1105_p5 = scmp.lt.u32.totalorder %s1101_s15, %s1484_s5 }
  0x49   :  { %p1107_p6 = pnand %p1105_p5, %p1102_p4 }
  0x4b   :  { %1110 = shalt.err (!%p1107_p6)
}
  0x4c   :  { %s1111_s27 = scalar_lea.vmem %s72_s10, 1024  ;;  %p1116_p8 = scmp.lt.s32.totalorder %s72_s10, %s72_s10 }
  0x4d   :  { %p1112_p7 = scmp.ne.s32.totalorder %s72_s10, %s1111_s27  ;;  %p1117_p9 = scmp.lt.s32.totalorder %s1111_s27, %s1111_s27 }
  0x4f   :  { %p1118_p10 = por %p1117_p9, %p1116_p8 }
  0x51   :  { %p1119_p11 = pnand %p1118_p10, %p1112_p7 }
  0x53   :  { %1122 = shalt.err (!%p1119_p11)
}
  0x54   :  { %77 = dma.hbm_to_vmem [thread:$0]  %s1484_s5, 1024, %s72_s10, [#allocation9], %s1157_s1, %s1157_s1, %s1158_s25  }
  0x55   :  { %1145 = dma.done.wait [#allocation3], 512  }
  0x56   :  { %1146 = vsyncadd [#allocation3], 4294966784 }
  0x57   :  { %1147 = dma.done.wait [#allocation6], 1024  }
  0x58   :  { %1148 = vsyncadd [#allocation6], 4294966272 }
  0x59   :  { %1149 = dma.done.wait [#allocation9], 2048  }
  0x5a   :  { %1150 = vsyncadd [#allocation9], 4294965248  ;;  %v1292_v0 = vld [vmem:[#allocation8] sm:$0xff]   ;;  %v1294_v1 = vld [vmem:[#allocation8 + $0x8] sm:$0xff]  }
  0x5b   :  { %811 = vmatprep.subr.bf16.mxu0 %v1292_v0  ;;  %v1299_v2 = vld [vmem:[#allocation8 + $0x10] sm:$0xff]   ;;  %v1303_v3 = vld [vmem:[#allocation8 + $0x18] sm:$0xff]   ;;  %v1305_v4 = vld [vmem:[#allocation2] sm:$0xff] }
  0x5c   :  { %812 = vmatpush3.bf16.msra.mxu0 %v1292_v0  ;;  %v1307_v5 = vld [vmem:[#allocation2 + $0x8] sm:$0xff]  ;;  %v1312_v7 = vld [vmem:[#allocation8 + $0x20] sm:$0xff]   ;;  %v1320_v11 = vld [vmem:[#allocation10 + $0x10] sm:$0xff]  }
  0x5d   :  { %813 = vmatprep.subr.bf16.mxu0 %v1294_v1  ;;  %v140_v6 = vpack.c.bf16 %v1307_v5, %v1305_v4  ;;  %v1315_v8 = vld [vmem:[#allocation10] sm:$0xff]   ;;  %v1317_v9 = vld [vmem:[#allocation10 + $0x8] sm:$0xff]   ;;  %v947_v12 = vld [vmem:[#allocation8 + $0x30] sm:$0xff]  }
  0x5e   :  { %v946_v10 = vld [vmem:[#allocation8 + $0x28] sm:$0xff]   ;;  %831 = vmatprep.subr.bf16.mxu1 %v1315_v8  ;;  %v948_v13 = vld [vmem:[#allocation8 + $0x38] sm:$0xff]   ;;  %v1330_v14 = vld [vmem:[#allocation2 + $0x10] sm:$0xff] }
  0x5f   :  { %827 = vmatprep.mubr.bf16.mxu0 %v140_v6  ;;  %832 = vmatpush3.bf16.msra.mxu1 %v1315_v8  ;;  %v1332_v15 = vld [vmem:[#allocation2 + $0x18] sm:$0xff]  ;;  %v1334_v16 = vld [vmem:[#allocation5] sm:$0xff]  ;;  %v1336_v17 = vld [vmem:[#allocation5 + $0x8] sm:$0xff] }
  0x60   :  { %814 = vmatpush3.bf16.msra.mxu0 %v1294_v1  ;;  %833 = vmatprep.subr.bf16.mxu1 %v1317_v9  ;;  %v141_v18 = vpack.c.bf16 %v1332_v15, %v1330_v14  ;;  %v370_v19 = vpack.c.bf16 %v1336_v17, %v1334_v16  ;;  %v1352_v20 = vld [vmem:[#allocation5 + $0x10] sm:$0xff]  ;;  %v1354_v21 = vld [vmem:[#allocation5 + $0x18] sm:$0xff]  ;;  %v1356_v22 = vld [vmem:[#allocation7] sm:$0xff] }
  0x61   :  { %815 = vmatprep.subr.bf16.mxu0 %v1299_v2  ;;  %v1358_v23 = vld [vmem:[#allocation7 + $0x8] sm:$0xff]  ;;  %v371_v24 = vpack.c.bf16 %v1354_v21, %v1352_v20  ;;  %v1374_v26 = vld [vmem:[#allocation7 + $0x10] sm:$0xff]  ;;  %v1376_v27 = vld [vmem:[#allocation7 + $0x18] sm:$0xff] }
  0x62   :  { %v498_v25 = vpack.c.bf16 %v1358_v23, %v1356_v22  ;;  %v499_v28 = vpack.c.bf16 %v1376_v27, %v1374_v26  ;;  %v1380_v29 = vld [vmem:[#allocation10 + $0x18] sm:$0xff]   ;;  %v1384_v30 = vld [vmem:[#allocation10 + $0x20] sm:$0xff]   ;;  %v1388_v31 = vld [vmem:[#allocation10 + $0x28] sm:$0xff]  }
  0x63   :  { %834 = vmatpush3.bf16.msra.mxu1 %v1317_v9  ;;  %v1390_v32 = vld [vmem:[#allocation10 + $0x30] sm:$0xff]   ;;  %v1395_v33 = vld [vmem:[#allocation10 + $0x38] sm:$0xff]   ;;  %v1404_v34 = vld [vmem:[%s1483_s4] ss:$0 sm:$0xff] }
  0x64   :  { %816 = vmatpush3.bf16.msra.mxu0 %v1299_v2  ;;  %835 = vmatprep.subr.bf16.mxu1 %v1320_v11 }
  0x65   :  { %817 = vmatprep.subr.bf16.mxu0 %v1303_v3 }
  0x67   :  { %836 = vmatpush3.bf16.msra.mxu1 %v1320_v11 }
  0x68   :  { %818 = vmatpush3.bf16.msra.mxu0 %v1303_v3  ;;  %837 = vmatprep.subr.bf16.mxu1 %v1380_v29 }
  0x69   :  { %819 = vmatprep.subr.bf16.mxu0 %v1312_v7 }
  0x6b   :  { %838 = vmatpush3.bf16.msra.mxu1 %v1380_v29 }
  0x6c   :  { %820 = vmatpush3.bf16.msra.mxu0 %v1312_v7  ;;  %839 = vmatprep.subr.bf16.mxu1 %v1384_v30 }
  0x6d   :  { %821 = vmatprep.subr.bf16.mxu0 %v946_v10 }
  0x6f   :  { %840 = vmatpush3.bf16.msra.mxu1 %v1384_v30 }
  0x70   :  { %822 = vmatpush3.bf16.msra.mxu0 %v946_v10  ;;  %841 = vmatprep.subr.bf16.mxu1 %v1388_v31 }
  0x71   :  { %823 = vmatprep.subr.bf16.mxu0 %v947_v12 }
  0x73   :  { %842 = vmatpush3.bf16.msra.mxu1 %v1388_v31 }
  0x74   :  { %824 = vmatpush3.bf16.msra.mxu0 %v947_v12  ;;  %843 = vmatprep.subr.bf16.mxu1 %v1390_v32 }
  0x75   :  { %825 = vmatprep.subr.bf16.mxu0 %v948_v13 }
  0x77   :  { %844 = vmatpush3.bf16.msra.mxu1 %v1390_v32 }
  0x78   :  { %826 = vmatpush3.bf16.msra.mxu0 %v948_v13  ;;  %845 = vmatprep.subr.bf16.mxu1 %v1395_v33 }
  0x79   :  { %851 = vmatprep.subr.bf16.mxu0 %v1292_v0 }
  0x7b   :  { %828 = vmatmul.mubr.bf16.vlgmr.msra.gmra.mrb[0].mxu0 %v141_v18  ;;  %846 = vmatpush3.bf16.msra.mxu1 %v1395_v33 }
  0x7c   :  { %852 = vmatpush3.bf16.msra.mxu0 %v1292_v0  ;;  %867 = vmatprep.mubr.bf16.mxu0 %v370_v19 }
  0x7d   :  { %853 = vmatprep.subr.bf16.mxu0 %v1294_v1  ;;  %871 = vmatprep.subr.bf16.mxu1 %v1315_v8 }
  0x80   :  { %854 = vmatpush3.bf16.msra.mxu0 %v1294_v1 }
  0x81   :  { %855 = vmatprep.subr.bf16.mxu0 %v1299_v2 }
  0x84   :  { %856 = vmatpush3.bf16.msra.mxu0 %v1299_v2 }
  0x85   :  { %857 = vmatprep.subr.bf16.mxu0 %v1303_v3 }
  0x88   :  { %858 = vmatpush3.bf16.msra.mxu0 %v1303_v3 }
  0x89   :  { %859 = vmatprep.subr.bf16.mxu0 %v1312_v7 }
  0x8c   :  { %860 = vmatpush3.bf16.msra.mxu0 %v1312_v7 }
  0x8d   :  { %861 = vmatprep.subr.bf16.mxu0 %v946_v10 }
  0x90   :  { %862 = vmatpush3.bf16.msra.mxu0 %v946_v10 }
  0x91   :  { %863 = vmatprep.subr.bf16.mxu0 %v947_v12 }
  0x94   :  { %864 = vmatpush3.bf16.msra.mxu0 %v947_v12 }
  0x95   :  { %865 = vmatprep.subr.bf16.mxu0 %v948_v13 }
  0x98   :  { %866 = vmatpush3.bf16.msra.mxu0 %v948_v13 }
  0x99   :  { %891 = vmatprep.subr.bf16.mxu0 %v1292_v0 }
  0x9b   :  { %868 = vmatmul.mubr.bf16.vlgmr.msra.gmra.mrb[4].mxu0 %v371_v24  ;;  %v750_v24 = vld [vmem:[%s1485_s6] ss:$0 sm:$0xff]  ;;  %s1162_s6 = smov [#allocation11]  }
  0x9c   :  { %892 = vmatpush3.bf16.msra.mxu0 %v1292_v0  ;;  %907 = vmatprep.mubr.bf16.mxu0 %v498_v25  ;;  %s719_s19 = sshll.u32 %s1162_s6, 4  ;;  %s720_s19 = int_to_ptr.vmem [resolvable:$true] %s719_s19 }
  0x9d   :  { %893 = vmatprep.subr.bf16.mxu0 %v1294_v1  ;;  %s1123_s20 = scalar_lea.vmem %s720_s19, 512  ;;  %p1128_p13 = scmp.lt.s32.totalorder %s720_s19, %s720_s19 }
  0x9e   :  { %p1124_p12 = scmp.ne.s32.totalorder %s720_s19, %s1123_s20  ;;  %p1129_p0 = scmp.lt.s32.totalorder %s1123_s20, %s1123_s20 }
  0xa0   :  { %894 = vmatpush3.bf16.msra.mxu0 %v1294_v1  ;;  %p1130_p1 = por %p1129_p0, %p1128_p13 }
  0xa1   :  { %895 = vmatprep.subr.bf16.mxu0 %v1299_v2 }
  0xa2   :  { %p1131_p2 = pnand %p1130_p1, %p1124_p12 }
  0xa4   :  { %896 = vmatpush3.bf16.msra.mxu0 %v1299_v2 }
  0xa5   :  { %897 = vmatprep.subr.bf16.mxu0 %v1303_v3 }
  0xa8   :  { %898 = vmatpush3.bf16.msra.mxu0 %v1303_v3 }
  0xa9   :  { %899 = vmatprep.subr.bf16.mxu0 %v1312_v7 }
  0xac   :  { %900 = vmatpush3.bf16.msra.mxu0 %v1312_v7 }
  0xad   :  { %901 = vmatprep.subr.bf16.mxu0 %v946_v10 }
  0xb0   :  { %902 = vmatpush3.bf16.msra.mxu0 %v946_v10 }
  0xb1   :  { %903 = vmatprep.subr.bf16.mxu0 %v947_v12 }
  0xb4   :  { %904 = vmatpush3.bf16.msra.mxu0 %v947_v12 }
  0xb5   :  { %905 = vmatprep.subr.bf16.mxu0 %v948_v13 }
  0xb8   :  { %906 = vmatpush3.bf16.msra.mxu0 %v948_v13 }
  0xbb   :  { %908 = vmatmul.mubr.bf16.vlgmr.msra.gmra.mrb[8].mxu0 %v499_v28 }
 0x14e   :  { %v829_v35 = vpop.f32.mrb[0].mxu0 }
 0x14f   :  { %v233_v36 = vadd.f32 %v829_v35, %v1404_v34  ;;  %v224_v37 = vpop.f32.mrb[1].mxu0 }
 0x150   :  { %v830_v38 = vpop.f32.mrb[2].mxu0  ;;  %v225_v41 = vadd.f32 %v1404_v34, %v224_v37 }
 0x151   :  { %v236_v39 = vadd.f32 %v830_v38, %v1404_v34  ;;  %v227_v40 = vpop.f32.mrb[3].mxu0 }
 0x152   :  { %v228_v42 = vadd.f32 %v1404_v34, %v227_v40 }
 0x153   :  { %v240_v43 = vpack.c.bf16 %v236_v39, %v233_v36 }
 0x154   :  { %v239_v44 = vpack.c.bf16 %v228_v42, %v225_v41 }
 0x156   :  { %957 = vtanh.bf16 %v239_v44 }
 0x157   :  { %959 = vtanh.bf16 %v240_v43 }
 0x161   :  { %v958_v45 = vpop.eup %957 }
 0x162   :  { %v960_v46 = vpop.eup %959  ;;  %847 = vmatprep.mubr.bf16.mxu1 %v958_v45 }
 0x163   :  { %848 = vmatmul.mubr.bf16.vlgmr.msra.gmra.mrb[0].mxu1 %v960_v46 }
 0x164   :  { %872 = vmatpush3.bf16.msra.mxu1 %v1315_v8 }
 0x165   :  { %873 = vmatprep.subr.bf16.mxu1 %v1317_v9 }
 0x168   :  { %874 = vmatpush3.bf16.msra.mxu1 %v1317_v9 }
 0x169   :  { %875 = vmatprep.subr.bf16.mxu1 %v1320_v11 }
 0x16c   :  { %876 = vmatpush3.bf16.msra.mxu1 %v1320_v11 }
 0x16d   :  { %877 = vmatprep.subr.bf16.mxu1 %v1380_v29 }
 0x16e   :  { %v869_v47 = vpop.f32.mrb[4].mxu0 }
 0x16f   :  { %v415_v48 = vadd.f32 %v869_v47, %v1404_v34  ;;  %v406_v49 = vpop.f32.mrb[5].mxu0 }
 0x170   :  { %v870_v50 = vpop.f32.mrb[6].mxu0  ;;  %878 = vmatpush3.bf16.msra.mxu1 %v1380_v29  ;;  %v407_v53 = vadd.f32 %v1404_v34, %v406_v49 }
 0x171   :  { %v418_v51 = vadd.f32 %v870_v50, %v1404_v34  ;;  %v409_v52 = vpop.f32.mrb[7].mxu0  ;;  %879 = vmatprep.subr.bf16.mxu1 %v1384_v30 }
 0x172   :  { %v410_v54 = vadd.f32 %v1404_v34, %v409_v52 }
 0x173   :  { %v422_v55 = vpack.c.bf16 %v418_v51, %v415_v48 }
 0x174   :  { %v421_v56 = vpack.c.bf16 %v410_v54, %v407_v53  ;;  %880 = vmatpush3.bf16.msra.mxu1 %v1384_v30 }
 0x175   :  { %881 = vmatprep.subr.bf16.mxu1 %v1388_v31 }
 0x176   :  { %961 = vtanh.bf16 %v421_v56 }
 0x177   :  { %963 = vtanh.bf16 %v422_v55 }
 0x178   :  { %882 = vmatpush3.bf16.msra.mxu1 %v1388_v31 }
 0x179   :  { %883 = vmatprep.subr.bf16.mxu1 %v1390_v32 }
 0x17c   :  { %884 = vmatpush3.bf16.msra.mxu1 %v1390_v32 }
 0x17d   :  { %885 = vmatprep.subr.bf16.mxu1 %v1395_v33 }
 0x180   :  { %886 = vmatpush3.bf16.msra.mxu1 %v1395_v33 }
 0x181   :  { %v962_v57 = vpop.eup %961  ;;  %911 = vmatprep.subr.bf16.mxu1 %v1315_v8 }
 0x182   :  { %v964_v58 = vpop.eup %963  ;;  %887 = vmatprep.mubr.bf16.mxu1 %v962_v57 }
 0x183   :  { %888 = vmatmul.mubr.bf16.vlgmr.msra.gmra.mrb[4].mxu1 %v964_v58 }
 0x184   :  { %912 = vmatpush3.bf16.msra.mxu1 %v1315_v8 }
 0x185   :  { %913 = vmatprep.subr.bf16.mxu1 %v1317_v9 }
 0x188   :  { %914 = vmatpush3.bf16.msra.mxu1 %v1317_v9 }
 0x189   :  { %915 = vmatprep.subr.bf16.mxu1 %v1320_v11 }
 0x18c   :  { %916 = vmatpush3.bf16.msra.mxu1 %v1320_v11 }
 0x18d   :  { %917 = vmatprep.subr.bf16.mxu1 %v1380_v29 }
 0x18e   :  { %v909_v59 = vpop.f32.mrb[8].mxu0 }
 0x18f   :  { %v534_v60 = vpop.f32.mrb[9].mxu0  ;;  %v543_v62 = vadd.f32 %v909_v59, %v1404_v34 }
 0x190   :  { %v910_v61 = vpop.f32.mrb[10].mxu0  ;;  %918 = vmatpush3.bf16.msra.mxu1 %v1380_v29  ;;  %v535_v1 = vadd.f32 %v1404_v34, %v534_v60 }
 0x191   :  { %v546_v63 = vadd.f32 %v910_v61, %v1404_v34  ;;  %v537_v0 = vpop.f32.mrb[11].mxu0  ;;  %919 = vmatprep.subr.bf16.mxu1 %v1384_v30 }
 0x192   :  { %v538_v2 = vadd.f32 %v1404_v34, %v537_v0 }
 0x193   :  { %v550_v3 = vpack.c.bf16 %v546_v63, %v543_v62 }
 0x194   :  { %v549_v6 = vpack.c.bf16 %v538_v2, %v535_v1  ;;  %920 = vmatpush3.bf16.msra.mxu1 %v1384_v30 }
 0x195   :  { %921 = vmatprep.subr.bf16.mxu1 %v1388_v31 }
 0x196   :  { %965 = vtanh.bf16 %v549_v6 }
 0x197   :  { %967 = vtanh.bf16 %v550_v3 }
 0x198   :  { %922 = vmatpush3.bf16.msra.mxu1 %v1388_v31 }
 0x199   :  { %923 = vmatprep.subr.bf16.mxu1 %v1390_v32 }
 0x19c   :  { %924 = vmatpush3.bf16.msra.mxu1 %v1390_v32 }
 0x19d   :  { %925 = vmatprep.subr.bf16.mxu1 %v1395_v33 }
 0x1a0   :  { %926 = vmatpush3.bf16.msra.mxu1 %v1395_v33 }
 0x1a1   :  { %v966_v7 = vpop.eup %965 }
 0x1a2   :  { %v968_v8 = vpop.eup %967  ;;  %927 = vmatprep.mubr.bf16.mxu1 %v966_v7 }
 0x1a3   :  { %928 = vmatmul.mubr.bf16.vlgmr.msra.gmra.mrb[8].mxu1 %v968_v8 }
 0x236   :  { %v849_v9 = vpop.f32.mrb[0].mxu1 }
 0x237   :  { %v325_v10 = vpop.f32.mrb[1].mxu1 }
 0x238   :  { %v850_v11 = vpop.f32.mrb[2].mxu1 }
 0x239   :  { %v341_v12 = vpack.c.bf16 %v850_v11, %v849_v9  ;;  %v328_v13 = vpop.f32.mrb[3].mxu1 }
 0x23a   :  { %v340_v18 = vpack.c.bf16 %v328_v13, %v325_v10 }
 0x23b   :  { %969 = vtanh.bf16 %v341_v12 }
 0x23c   :  { %971 = vtanh.bf16 %v340_v18 }
 0x246   :  { %v970_v19 = vpop.eup %969 }
 0x247   :  { %v972_v25 = vpop.eup %971  ;;  %v346_v28 = vunpack.c.l.bf16 %v970_v19  ;;  %v347_v31 = vunpack.c.h.bf16 %v970_v19 }
 0x248   :  { %v344_v29 = vunpack.c.l.bf16 %v972_v25  ;;  %v345_v33 = vunpack.c.h.bf16 %v972_v25 }
 0x249   :  { %v356_v30 = vmul.f32 %v750_v24, %v346_v28  ;;  %v357_v34 = vmul.f32 %v750_v24, %v347_v31 }
 0x24a   :  { %v354_v32 = vmul.f32 %v750_v24, %v344_v29  ;;  %v355_v35 = vmul.f32 %v750_v24, %v345_v33 }
 0x24b   :  { %362 = vadd.xlane.f32.xlu1 %v356_v30 }
 0x24c   :  { %358 = vadd.xlane.f32.xlu0 %v354_v32 }
 0x24f   :  { %364 = vadd.xlane.f32.xlu1 %v357_v34 }
 0x250   :  { %360 = vadd.xlane.f32.xlu0 %v355_v35 }
 0x256   :  { %v889_v36 = vpop.f32.mrb[4].mxu1 }
 0x257   :  { %v459_v37 = vpop.f32.mrb[5].mxu1 }
 0x258   :  { %v890_v38 = vpop.f32.mrb[6].mxu1 }
 0x259   :  { %v475_v39 = vpack.c.bf16 %v890_v38, %v889_v36  ;;  %v462_v40 = vpop.f32.mrb[7].mxu1 }
 0x25a   :  { %v474_v41 = vpack.c.bf16 %v462_v40, %v459_v37 }
 0x25b   :  { %973 = vtanh.bf16 %v475_v39 }
 0x25c   :  { %975 = vtanh.bf16 %v474_v41 }
 0x266   :  { %v974_v42 = vpop.eup %973 }
 0x267   :  { %v976_v43 = vpop.eup %975  ;;  %v481_v44 = vunpack.c.h.bf16 %v974_v42  ;;  %v480_v45 = vunpack.c.l.bf16 %v974_v42 }
 0x268   :  { %v479_v48 = vunpack.c.h.bf16 %v976_v43  ;;  %v478_v49 = vunpack.c.l.bf16 %v976_v43 }
 0x269   :  { %v485_v46 = vmul.f32 %v750_v24, %v481_v44  ;;  %v484_v47 = vmul.f32 %v750_v24, %v480_v45 }
 0x26a   :  { %v483_v50 = vmul.f32 %v750_v24, %v479_v48  ;;  %v482_v51 = vmul.f32 %v750_v24, %v478_v49 }
 0x26b   :  { %492 = vadd.xlane.f32.xlu1 %v485_v46  ;;  %490 = vadd.xlane.f32.xlu0 %v484_v47 }
 0x26f   :  { %488 = vadd.xlane.f32.xlu1 %v483_v50  ;;  %486 = vadd.xlane.f32.xlu0 %v482_v51 }
 0x276   :  { %v929_v52 = vpop.f32.mrb[8].mxu1 }
 0x277   :  { %v587_v53 = vpop.f32.mrb[9].mxu1 }
 0x278   :  { %v930_v54 = vpop.f32.mrb[10].mxu1 }
 0x279   :  { %v603_v55 = vpack.c.bf16 %v930_v54, %v929_v52  ;;  %v590_v56 = vpop.f32.mrb[11].mxu1 }
 0x27a   :  { %v602_v57 = vpack.c.bf16 %v590_v56, %v587_v53 }
 0x27b   :  { %977 = vtanh.bf16 %v603_v55 }
 0x27c   :  { %979 = vtanh.bf16 %v602_v57 }
 0x286   :  { %v978_v58 = vpop.eup %977 }
 0x287   :  { %v980_v59 = vpop.eup %979  ;;  %v609_v0 = vunpack.c.h.bf16 %v978_v58  ;;  %v608_v1 = vunpack.c.l.bf16 %v978_v58 }
 0x288   :  { %v607_v60 = vunpack.c.h.bf16 %v980_v59  ;;  %v606_v61 = vunpack.c.l.bf16 %v980_v59 }
 0x289   :  { %v613_v2 = vmul.f32 %v750_v24, %v609_v0  ;;  %v612_v3 = vmul.f32 %v750_v24, %v608_v1 }
 0x28a   :  { %v611_v62 = vmul.f32 %v750_v24, %v607_v60  ;;  %v610_v63 = vmul.f32 %v750_v24, %v606_v61 }
 0x28c   :  { %616 = vadd.xlane.f32.xlu1 %v611_v62  ;;  %614 = vadd.xlane.f32.xlu0 %v610_v63 }
 0x290   :  { %620 = vadd.xlane.f32.xlu1 %v613_v2  ;;  %618 = vadd.xlane.f32.xlu0 %v612_v3 }
 0x2d8   :  { %v363_v6 = vpop.xlane.xlu1 %362 }
 0x2d9   :  { %v359_v7 = vpop.xlane.xlu0 %358 }
 0x2dc   :  { %v365_v8 = vpop.xlane.xlu1 %364 }
 0x2dd   :  { %v361_v9 = vpop.xlane.xlu0 %360 }
 0x2f8   :  { %v493_v10 = vpop.xlane.xlu1 %492  ;;  %v491_v11 = vpop.xlane.xlu0 %490 }
 0x2f9   :  { %v625_v31 = vmax.f32 %v365_v8, %v493_v10  ;;  %v624_v35 = vmax.f32 %v363_v6, %v491_v11 }
 0x2fc   :  { %v489_v12 = vpop.xlane.xlu1 %488  ;;  %v487_v13 = vpop.xlane.xlu0 %486 }
 0x2fd   :  { %v623_v18 = vmax.f32 %v361_v9, %v489_v12  ;;  %v622_v19 = vmax.f32 %v359_v7, %v487_v13 }
 0x319   :  { %v617_v25 = vpop.xlane.xlu1 %616  ;;  %v615_v28 = vpop.xlane.xlu0 %614 }
 0x31a   :  { %v627_v29 = vmax.f32 %v623_v18, %v617_v25  ;;  %v626_v30 = vmax.f32 %v622_v19, %v615_v28 }
 0x31c   :  { %v631_v32 = vsub.f32 %v361_v9, %v627_v29  ;;  %v643_v33 = vsub.f32 %v489_v12, %v627_v29  ;;  %v655_v24 = vsub.f32 %v617_v25, %v627_v29  ;;  %v630_v34 = vsub.f32 %v359_v7, %v626_v30 }
 0x31d   :  { %v642_v36 = vsub.f32 %v487_v13, %v626_v30  ;;  %v654_v37 = vsub.f32 %v615_v28, %v626_v30  ;;  %v621_v38 = vpop.xlane.xlu1 %620  ;;  %v619_v39 = vpop.xlane.xlu0 %618 }
 0x31e   :  { %v636_v40 = vmul.f32 1.442695, %v631_v32  ;;  %v648_v41 = vmul.f32 1.442695, %v643_v33  ;;  %v660_v42 = vmul.f32 1.442695, %v655_v24  ;;  %v629_v43 = vmax.f32 %v625_v31, %v621_v38 }
 0x31f   :  { %v634_v44 = vmul.f32 1.442695, %v630_v34  ;;  %v646_v45 = vmul.f32 1.442695, %v642_v36  ;;  %v628_v46 = vmax.f32 %v624_v35, %v619_v39  ;;  %v658_v50 = vmul.f32 1.442695, %v654_v37 }
 0x320   :  { %981 = vpow2.f32 %v636_v40  ;;  %v633_v47 = vsub.f32 %v365_v8, %v629_v43  ;;  %v645_v48 = vsub.f32 %v493_v10, %v629_v43  ;;  %v657_v49 = vsub.f32 %v621_v38, %v629_v43 }
 0x321   :  { %983 = vpow2.f32 %v648_v41  ;;  %v632_v51 = vsub.f32 %v363_v6, %v628_v46  ;;  %v644_v53 = vsub.f32 %v491_v11, %v628_v46  ;;  %v656_v56 = vsub.f32 %v619_v39, %v628_v46 }
 0x322   :  { %985 = vpow2.f32 %v660_v42  ;;  %v640_v52 = vmul.f32 1.442695, %v633_v47  ;;  %v652_v54 = vmul.f32 1.442695, %v645_v48  ;;  %v664_v55 = vmul.f32 1.442695, %v657_v49 }
 0x323   :  { %987 = vpow2.f32 %v634_v44  ;;  %v638_v57 = vmul.f32 1.442695, %v632_v51  ;;  %v650_v58 = vmul.f32 1.442695, %v644_v53  ;;  %v662_v59 = vmul.f32 1.442695, %v656_v56 }
 0x324   :  { %989 = vpow2.f32 %v646_v45 }
 0x325   :  { %991 = vpow2.f32 %v658_v50 }
 0x326   :  { %993 = vpow2.f32 %v640_v52 }
 0x327   :  { %995 = vpow2.f32 %v652_v54 }
 0x328   :  { %997 = vpow2.f32 %v664_v55 }
 0x329   :  { %999 = vpow2.f32 %v638_v57 }
 0x32a   :  { %v982_v60 = vpop.eup %981  ;;  %1001 = vpow2.f32 %v650_v58 }
 0x32b   :  { %v984_v61 = vpop.eup %983  ;;  %1003 = vpow2.f32 %v662_v59 }
 0x32c   :  { %v986_v62 = vpop.eup %985  ;;  %v667_v63 = vadd.f32 %v984_v61, %v982_v60 }
 0x32d   :  { %v988_v0 = vpop.eup %987 }
 0x32e   :  { %v990_v1 = vpop.eup %989  ;;  %v671_v2 = vadd.f32 %v986_v62, %v667_v63 }
 0x32f   :  { %v992_v3 = vpop.eup %991  ;;  %v666_v6 = vadd.f32 %v990_v1, %v988_v0 }
 0x330   :  { %v994_v7 = vpop.eup %993  ;;  %1005 = vrcp.f32 %v671_v2 }
 0x331   :  { %v996_v8 = vpop.eup %995  ;;  %v670_v9 = vadd.f32 %v992_v3, %v666_v6 }
 0x332   :  { %v998_v10 = vpop.eup %997  ;;  %v669_v11 = vadd.f32 %v996_v8, %v994_v7 }
 0x333   :  { %v1000_v12 = vpop.eup %999  ;;  %1007 = vrcp.f32 %v670_v9 }
 0x334   :  { %v1002_v13 = vpop.eup %1001  ;;  %v673_v18 = vadd.f32 %v998_v10, %v669_v11 }
 0x335   :  { %v668_v19 = vadd.f32 %v1002_v13, %v1000_v12  ;;  %v1004_v25 = vpop.eup %1003 }
 0x336   :  { %1009 = vrcp.f32 %v673_v18 }
 0x337   :  { %v672_v28 = vadd.f32 %v1004_v25, %v668_v19 }
 0x339   :  { %1011 = vrcp.f32 %v672_v28 }
 0x33a   :  { %v1006_v29 = vpop.eup %1005 }
 0x33b   :  { %v699_v30 = vmul.f32 %v1006_v29, %v986_v62  ;;  %v679_v31 = vmul.f32 %v1006_v29, %v982_v60  ;;  %v687_v32 = vmul.f32 %v1006_v29, %v984_v61 }
 0x33d   :  { %v1008_v33 = vpop.eup %1007  ;;  %v683_v24 = vmul.f32 %v679_v31, %v1307_v5  ;;  %v691_v34 = vmul.f32 %v687_v32, %v1336_v17  ;;  %v703_v39 = vmul.f32 %v699_v30, %v1358_v23 }
 0x33e   :  { %v698_v35 = vmul.f32 %v1008_v33, %v992_v3  ;;  %v678_v36 = vmul.f32 %v1008_v33, %v988_v0  ;;  %v686_v37 = vmul.f32 %v1008_v33, %v990_v1 }
 0x33f   :  { %v695_v38 = vadd.f32 %v691_v34, %v683_v24 }
 0x340   :  { %v1010_v40 = vpop.eup %1009  ;;  %v682_v41 = vmul.f32 %v678_v36, %v1305_v4  ;;  %v690_v42 = vmul.f32 %v686_v37, %v1334_v16  ;;  %v702_v5 = vmul.f32 %v698_v35, %v1356_v22 }
 0x341   :  { %v701_v43 = vmul.f32 %v1010_v40, %v998_v10  ;;  %v681_v44 = vmul.f32 %v1010_v40, %v994_v7  ;;  %v689_v45 = vmul.f32 %v1010_v40, %v996_v8  ;;  %v707_v46 = vadd.f32 %v703_v39, %v695_v38 }
 0x342   :  { %v694_v47 = vadd.f32 %v690_v42, %v682_v41 }
 0x343   :  { %v1012_v48 = vpop.eup %1011  ;;  %v685_v17 = vmul.f32 %v681_v44, %v1332_v15  ;;  %v693_v49 = vmul.f32 %v689_v45, %v1354_v21  ;;  %711 = vst [vmem:[#allocation11 + $0x8] sm:$0xff] %v707_v46  ;;  %v705_v16 = vmul.f32 %v701_v43, %v1376_v27 }
 0x344   :  { %v700_v50 = vmul.f32 %v1012_v48, %v1004_v25  ;;  %v680_v23 = vmul.f32 %v1012_v48, %v1000_v12  ;;  %v688_v51 = vmul.f32 %v1012_v48, %v1002_v13  ;;  %v706_v52 = vadd.f32 %v702_v5, %v694_v47 }
 0x345   :  { %v697_v4 = vadd.f32 %v693_v49, %v685_v17 }
 0x346   :  { %v684_v53 = vmul.f32 %v680_v23, %v1330_v14  ;;  %v692_v54 = vmul.f32 %v688_v51, %v1352_v20  ;;  %710 = vst [vmem:[#allocation11] sm:$0xff] %v706_v52  ;;  %v704_v15 = vmul.f32 %v700_v50, %v1374_v26 }
 0x347   :  { %v709_v55 = vadd.f32 %v705_v16, %v697_v4 }
 0x348   :  { %v696_v22 = vadd.f32 %v692_v54, %v684_v53 }
 0x349   :  { %713 = vst [vmem:[#allocation11 + $0x18] sm:$0xff] %v709_v55 }
 0x34a   :  { %v708_v21 = vadd.f32 %v704_v15, %v696_v22 }
 0x34c   :  { %712 = vst [vmem:[#allocation11 + $0x10] sm:$0xff] %v708_v21 }
 0x34d   :  { %1134 = shalt.err (!%p1131_p2)
}
 0x34e   :  { %s1135_s23 = scalar_lea.hbm %s1486_s7, 512 }
 0x34f   :  { %p1136_p3 = scmp.ne.s32.totalorder %s1486_s7, %s1135_s23  ;;  %p1139_p4 = scmp.lt.u32.totalorder %s1135_s23, %s1486_s7 }
 0x351   :  { %p1141_p5 = pnand %p1139_p4, %p1136_p3 }
 0x353   :  { %1144 = shalt.err (!%p1141_p5)
}
 0x354   :  { %725 = dma.vmem_to_hbm [thread:$0]  %s720_s19, 512, %s1486_s7, [#allocation4], %s1155_s13, %s1155_s13, %s1156_s14  }
 0x355   :  { %1151 = dma.done.wait [#allocation4], 512  }
 0x356   :  { %1152 = vsyncadd [#allocation4], 4294966784 }
 0x357   :  { %729 = vsyncpa [#allocation3], 1 }
 0x358   :  { %730 = vsyncpa [#allocation6], 1 }
 0x359   :  { %731 = vsyncpa [#allocation9], 1 }
 0x35a   :  { %732 = vsyncpa [#allocation4], 1 }

</bundles_post_ra>
